<compile_context>
chip_gen: v5e
topology: v5e:2x2
jax: 0.10.0
libtpu: 0.0.40
codegen_flags: <defaults>
</compile_context>

<pallas_src>
import functools

import jax
import jax.numpy as jnp
from jax.experimental import pallas as pl
from jax.experimental.pallas import tpu as pltpu


def _mlp_kernel(x_ref, diff_ref, w1_ref, b1_ref, w2_ref, b2_ref,
                w3d_ref, w3r_ref, b3_ref, out_ref):
    # x tile: (TB, Din) bf16; weights bf16; biases / diff / diff-column f32.
    x = x_ref[...]
    h1 = jnp.dot(x, w1_ref[...], preferred_element_type=jnp.float32)   # (TB, 128)
    h1 = jnp.maximum(h1 + b1_ref[...], 0.0)                            # f32 epilogue
    h2 = jnp.dot(h1.astype(jnp.bfloat16), w2_ref[...],
                 preferred_element_type=jnp.float32)                   # (TB, 64)
    h2 = jnp.maximum(h2 + b2_ref[...], 0.0)
    # fc3 over concat([diff, h2]) == diff * W3[:, 0] + h2 @ W3[:, 1:]^T + b3
    out = jnp.dot(h2.astype(jnp.bfloat16), w3r_ref[...],
                  preferred_element_type=jnp.float32)                  # (TB, Np)
    out = out + diff_ref[...] * w3d_ref[...] + b3_ref[...]
    # output_activation defaults to nn.Identity() -> no-op
    out_ref[...] = out.astype(out_ref.dtype)


@functools.partial(jax.jit, static_argnames=("max_tb",))
def image_predict_mlp(x, diff, params, *, max_tb=1024):
    """Forward pass.

    x:    (B, input_dim) float array
    diff: (B,)           float array
    params: PyTorch-shaped f32 params (W1, b1, W2, b2, W3, b3)
    """
    W1, b1, W2, b2, W3, b3 = params
    B, din = x.shape
    out_dim = W3.shape[0]

    # ---- lane-dense output padding (multiple of 128 columns) ----
    out_pad = max(128, ((out_dim + 127) // 128) * 128)

    # ---- weight plumbing: transpose / split diff column / pad / cast ----
    w1t = W1.T.astype(jnp.bfloat16)                                   # (Din, 128)
    b1r = b1.reshape(1, 128).astype(jnp.float32)
    w2t = W2.T.astype(jnp.bfloat16)                                   # (128, 64)
    b2r = b2.reshape(1, 64).astype(jnp.float32)
    w3_diff = jnp.pad(W3[:, 0].reshape(1, out_dim),
                      ((0, 0), (0, out_pad - out_dim))).astype(jnp.float32)
    w3_rest = jnp.pad(W3[:, 1:].T,
                      ((0, 0), (0, out_pad - out_dim))).astype(jnp.bfloat16)
    b3r = jnp.pad(b3.reshape(1, out_dim),
                  ((0, 0), (0, out_pad - out_dim))).astype(jnp.float32)

    # ---- batch tiling: TB multiple of 8, pad B up to a multiple of TB ----
    b_up8 = ((B + 7) // 8) * 8
    tb = min(max_tb, b_up8)
    b_pad = pl.cdiv(b_up8, tb) * tb
    grid = (b_pad // tb,)

    x_p = jnp.pad(x.astype(jnp.float32),
                  ((0, b_pad - B), (0, 0))).astype(jnp.bfloat16)
    diff_p = jnp.pad(diff.astype(jnp.float32), (0, b_pad - B)).reshape(b_pad, 1)

    cost = pl.CostEstimate(
        flops=2 * b_pad * (din * 128 + 128 * 64 + 64 * out_pad),
        transcendentals=0,
        bytes_accessed=(x_p.size * 2 + diff_p.size * 4
                        + w1t.size * 2 + w2t.size * 2 + w3_rest.size * 2
                        + (b1r.size + b2r.size + b3r.size + w3_diff.size) * 4
                        + b_pad * out_pad * 4),
    )

    # Tiled activations, VMEM-resident weights (index_map always (0, 0)).
    resident = lambda shape: pl.BlockSpec(shape, lambda i: (0, 0))
    out_p = pl.pallas_call(
        _mlp_kernel,
        out_shape=jax.ShapeDtypeStruct((b_pad, out_pad), jnp.float32),
        grid=grid,
        in_specs=[
            pl.BlockSpec((tb, din), lambda i: (i, 0)),       # x tile
            pl.BlockSpec((tb, 1), lambda i: (i, 0)),         # diff tile
            resident((din, 128)),                            # W1^T
            resident((1, 128)),                              # b1
            resident((128, 64)),                             # W2^T
            resident((1, 64)),                               # b2
            resident((1, out_pad)),                          # W3 diff column
            resident((64, out_pad)),                         # W3[:, 1:]^T (padded)
            resident((1, out_pad)),                          # b3 (padded)
        ],
        out_specs=pl.BlockSpec((tb, out_pad), lambda i: (i, 0)),
        compiler_params=pltpu.CompilerParams(
            dimension_semantics=("parallel",)),
        cost_estimate=cost,
    )(x_p, diff_p, w1t, b1r, w2t, b2r, w3_diff, w3_rest, b3r)

    # Strip batch / lane padding.
    return out_p[:B, :out_dim]


def init_params(key, input_dim, output_dim):
    """Deterministic synthetic params with PyTorch nn.Linear shapes (f32)."""
    k1, k2, k3, k4, k5, k6 = jax.random.split(key, 6)
    W1 = jax.random.normal(k1, (128, input_dim), jnp.float32) * 0.05
    b1 = jax.random.normal(k2, (128,), jnp.float32) * 0.05
    W2 = jax.random.normal(k3, (64, 128), jnp.float32) * 0.05
    b2 = jax.random.normal(k4, (64,), jnp.float32) * 0.05
    W3 = jax.random.normal(k5, (output_dim, 65), jnp.float32) * 0.05
    b3 = jax.random.normal(k6, (output_dim,), jnp.float32) * 0.05
    return (W1, b1, W2, b2, W3, b3)


def reference(x, diff, params):
    """Pure-JAX f32 reference matching the PyTorch module exactly."""
    W1, b1, W2, b2, W3, b3 = params
    h1 = jnp.maximum(x @ W1.T + b1, 0.0)
    h2 = jnp.maximum(h1 @ W2.T + b2, 0.0)
    cat = jnp.concatenate([diff.reshape(-1, 1), h2], axis=1)
    return cat @ W3.T + b3


if __name__ == "__main__":
    B, INPUT_DIM, OUTPUT_DIM = 8, 32, 16

    key = jax.random.PRNGKey(0)
    kx, kd, kp = jax.random.split(key, 3)
    x = jax.random.normal(kx, (B, INPUT_DIM), jnp.float32)
    diff = jax.random.normal(kd, (B,), jnp.float32)
    params = init_params(kp, INPUT_DIM, OUTPUT_DIM)

    out = image_predict_mlp(x, diff, params)
    out = jax.block_until_ready(out)

    ref = reference(x, diff, params)
    assert out.shape == (B, OUTPUT_DIM)
    # bf16 MXU inputs with f32 accumulation -> small relative error vs f32 ref.
    assert jnp.allclose(out, ref, atol=1e-2, rtol=1e-2)

    print("KERNEL_OK")
</pallas_src>

<mosaic_0001>
module attributes {stable_mosaic.version = 11 : i64} {
  func.func @_mlp_kernel(%arg0: i32, %arg1: memref<8x32xbf16, #tpu.memory_space<vmem>>, %arg2: memref<8x1xf32, #tpu.memory_space<vmem>>, %arg3: memref<32x128xbf16, #tpu.memory_space<vmem>>, %arg4: memref<1x128xf32, #tpu.memory_space<vmem>>, %arg5: memref<128x64xbf16, #tpu.memory_space<vmem>>, %arg6: memref<1x64xf32, #tpu.memory_space<vmem>>, %arg7: memref<1x128xf32, #tpu.memory_space<vmem>>, %arg8: memref<64x128xbf16, #tpu.memory_space<vmem>>, %arg9: memref<1x128xf32, #tpu.memory_space<vmem>>, %arg10: memref<8x128xf32, #tpu.memory_space<vmem>>) attributes {dimension_semantics = [#tpu.dimension_semantics<parallel>], iteration_bounds = array<i64: 1>, scalar_prefetch = 0 : i64, scratch_operands = 0 : i64, tpu.core_type = #tpu.core_type<tc>, window_params = [{transform_indices = @transform_0, window_bounds = array<i64: 8, 32>}, {transform_indices = @transform_1, window_bounds = array<i64: 8, 1>}, {pipeline_mode = #tpu.pipeline_mode<synchronous>, transform_indices = @transform_2, window_bounds = array<i64: 32, 128>}, {pipeline_mode = #tpu.pipeline_mode<synchronous>, transform_indices = @transform_3, window_bounds = array<i64: 1, 128>}, {pipeline_mode = #tpu.pipeline_mode<synchronous>, transform_indices = @transform_4, window_bounds = array<i64: 128, 64>}, {pipeline_mode = #tpu.pipeline_mode<synchronous>, transform_indices = @transform_5, window_bounds = array<i64: 1, 64>}, {pipeline_mode = #tpu.pipeline_mode<synchronous>, transform_indices = @transform_6, window_bounds = array<i64: 1, 128>}, {pipeline_mode = #tpu.pipeline_mode<synchronous>, transform_indices = @transform_7, window_bounds = array<i64: 64, 128>}, {pipeline_mode = #tpu.pipeline_mode<synchronous>, transform_indices = @transform_8, window_bounds = array<i64: 1, 128>}, {transform_indices = @transform_9, window_bounds = array<i64: 8, 128>}]} {
    %c0 = arith.constant 0 : index
    %c0_0 = arith.constant 0 : index
    %0 = vector.load %arg1[%c0, %c0_0] : memref<8x32xbf16, #tpu.memory_space<vmem>>, vector<8x32xbf16>
    %c0_1 = arith.constant 0 : index
    %c0_2 = arith.constant 0 : index
    %1 = vector.load %arg3[%c0_1, %c0_2] : memref<32x128xbf16, #tpu.memory_space<vmem>>, vector<32x128xbf16>
    %cst = arith.constant dense<0.000000e+00> : vector<8x128xf32>
    %2 = tpu.matmul %0, %1, %cst {dimension_numbers = #tpu.dot_dimension_numbers<[1], [0], [0], [1], [0, 0, 1, 1], [], []>} : vector<8x32xbf16>, vector<32x128xbf16>, vector<8x128xf32> -> vector<8x128xf32>
    %c0_3 = arith.constant 0 : index
    %c0_4 = arith.constant 0 : index
    %3 = vector.load %arg4[%c0_3, %c0_4] : memref<1x128xf32, #tpu.memory_space<vmem>>, vector<1x128xf32>
    %4 = vector.broadcast %3 : vector<1x128xf32> to vector<8x128xf32>
    %5 = arith.addf %2, %4 : vector<8x128xf32>
    %cst_5 = arith.constant 0.000000e+00 : f32
    %6 = vector.broadcast %cst_5 : f32 to vector<8x128xf32>
    %7 = arith.maximumf %5, %6 : vector<8x128xf32>
    %8 = arith.truncf %7 : vector<8x128xf32> to vector<8x128xbf16>
    %c0_6 = arith.constant 0 : index
    %c0_7 = arith.constant 0 : index
    %9 = vector.load %arg5[%c0_6, %c0_7] : memref<128x64xbf16, #tpu.memory_space<vmem>>, vector<128x64xbf16>
    %cst_8 = arith.constant dense<0.000000e+00> : vector<8x64xf32>
    %10 = tpu.matmul %8, %9, %cst_8 {dimension_numbers = #tpu.dot_dimension_numbers<[1], [0], [0], [1], [0, 0, 1, 1], [], []>} : vector<8x128xbf16>, vector<128x64xbf16>, vector<8x64xf32> -> vector<8x64xf32>
    %c0_9 = arith.constant 0 : index
    %c0_10 = arith.constant 0 : index
    %11 = vector.load %arg6[%c0_9, %c0_10] : memref<1x64xf32, #tpu.memory_space<vmem>>, vector<1x64xf32>
    %12 = vector.broadcast %11 : vector<1x64xf32> to vector<8x64xf32>
    %13 = arith.addf %10, %12 : vector<8x64xf32>
    %cst_11 = arith.constant 0.000000e+00 : f32
    %14 = vector.broadcast %cst_11 : f32 to vector<8x64xf32>
    %15 = arith.maximumf %13, %14 : vector<8x64xf32>
    %16 = arith.truncf %15 : vector<8x64xf32> to vector<8x64xbf16>
    %c0_12 = arith.constant 0 : index
    %c0_13 = arith.constant 0 : index
    %17 = vector.load %arg8[%c0_12, %c0_13] : memref<64x128xbf16, #tpu.memory_space<vmem>>, vector<64x128xbf16>
    %cst_14 = arith.constant dense<0.000000e+00> : vector<8x128xf32>
    %18 = tpu.matmul %16, %17, %cst_14 {dimension_numbers = #tpu.dot_dimension_numbers<[1], [0], [0], [1], [0, 0, 1, 1], [], []>} : vector<8x64xbf16>, vector<64x128xbf16>, vector<8x128xf32> -> vector<8x128xf32>
    %c0_15 = arith.constant 0 : index
    %c0_16 = arith.constant 0 : index
    %19 = vector.load %arg2[%c0_15, %c0_16] : memref<8x1xf32, #tpu.memory_space<vmem>>, vector<8x1xf32>
    %c0_17 = arith.constant 0 : index
    %c0_18 = arith.constant 0 : index
    %20 = vector.load %arg7[%c0_17, %c0_18] : memref<1x128xf32, #tpu.memory_space<vmem>>, vector<1x128xf32>
    %21 = vector.broadcast %19 : vector<8x1xf32> to vector<8x128xf32>
    %22 = vector.broadcast %20 : vector<1x128xf32> to vector<8x128xf32>
    %23 = arith.mulf %21, %22 : vector<8x128xf32>
    %24 = arith.addf %18, %23 : vector<8x128xf32>
    %c0_19 = arith.constant 0 : index
    %c0_20 = arith.constant 0 : index
    %25 = vector.load %arg9[%c0_19, %c0_20] : memref<1x128xf32, #tpu.memory_space<vmem>>, vector<1x128xf32>
    %26 = vector.broadcast %25 : vector<1x128xf32> to vector<8x128xf32>
    %27 = arith.addf %24, %26 : vector<8x128xf32>
    %c0_21 = arith.constant 0 : index
    %c0_22 = arith.constant 0 : index
    %28 = vector.load %arg10[%c0_21, %c0_22] : memref<8x128xf32, #tpu.memory_space<vmem>>, vector<8x128xf32>
    tpu.vector_store %arg10[%c0_21, %c0_22], %27 {strides = array<i32>} : memref<8x128xf32, #tpu.memory_space<vmem>>, vector<8x128xf32>,
    return
  }
  func.func @transform_0(%arg0: i32) -> (i32, i32) {
    %c0_i32 = arith.constant 0 : i32
    %c0_i32_0 = arith.constant 0 : i32
    return %arg0, %c0_i32 : i32, i32
  }
  func.func @transform_1(%arg0: i32) -> (i32, i32) {
    %c0_i32 = arith.constant 0 : i32
    %c0_i32_0 = arith.constant 0 : i32
    return %arg0, %c0_i32 : i32, i32
  }
  func.func @transform_2(%arg0: i32) -> (i32, i32) {
    %c0_i32 = arith.constant 0 : i32
    %c0_i32_0 = arith.constant 0 : i32
    %c0_i32_1 = arith.constant 0 : i32
    return %c0_i32, %c0_i32_0 : i32, i32
  }
  func.func @transform_3(%arg0: i32) -> (i32, i32) {
    %c0_i32 = arith.constant 0 : i32
    %c0_i32_0 = arith.constant 0 : i32
    %c0_i32_1 = arith.constant 0 : i32
    return %c0_i32, %c0_i32_0 : i32, i32
  }
  func.func @transform_4(%arg0: i32) -> (i32, i32) {
    %c0_i32 = arith.constant 0 : i32
    %c0_i32_0 = arith.constant 0 : i32
    %c0_i32_1 = arith.constant 0 : i32
    return %c0_i32, %c0_i32_0 : i32, i32
  }
  func.func @transform_5(%arg0: i32) -> (i32, i32) {
    %c0_i32 = arith.constant 0 : i32
    %c0_i32_0 = arith.constant 0 : i32
    %c0_i32_1 = arith.constant 0 : i32
    return %c0_i32, %c0_i32_0 : i32, i32
  }
  func.func @transform_6(%arg0: i32) -> (i32, i32) {
    %c0_i32 = arith.constant 0 : i32
    %c0_i32_0 = arith.constant 0 : i32
    %c0_i32_1 = arith.constant 0 : i32
    return %c0_i32, %c0_i32_0 : i32, i32
  }
  func.func @transform_7(%arg0: i32) -> (i32, i32) {
    %c0_i32 = arith.constant 0 : i32
    %c0_i32_0 = arith.constant 0 : i32
    %c0_i32_1 = arith.constant 0 : i32
    return %c0_i32, %c0_i32_0 : i32, i32
  }
  func.func @transform_8(%arg0: i32) -> (i32, i32) {
    %c0_i32 = arith.constant 0 : i32
    %c0_i32_0 = arith.constant 0 : i32
    %c0_i32_1 = arith.constant 0 : i32
    return %c0_i32, %c0_i32_0 : i32, i32
  }
  func.func @transform_9(%arg0: i32) -> (i32, i32) {
    %c0_i32 = arith.constant 0 : i32
    %c0_i32_0 = arith.constant 0 : i32
    return %arg0, %c0_i32 : i32, i32
  }
}

</mosaic_0001>

<bundles_post_ra>
// kernel: image_predict_mlp.1
= control target key start
LH: loop header
LB: loop body
LE: loop exit
PB: predicated region body
PF: predicated region fallthrough
CT: control target
= control target key end

     0   :  { %s459_s0 = inlined_call_operand.vmem [shape: bf16[8,32], index: 0, kind: input, shape index: {}]   ;;  %s460_s1 = inlined_call_operand.vmem [shape: f32[8,1], index: 1, kind: input, shape index: {}]   ;;  %s461_s2 = inlined_call_operand.vmem [shape: bf16[32,128], index: 2, kind: input, shape index: {}]   ;;  %s462_s3 = inlined_call_operand.vmem [shape: f32[1,128], index: 3, kind: input, shape index: {}]   ;;  %s463_s4 = inlined_call_operand.vmem [shape: bf16[128,64], index: 4, kind: input, shape index: {}]   ;;  %s464_s5 = inlined_call_operand.vmem [shape: f32[1,64], index: 5, kind: input, shape index: {}]   ;;  %s465_s6 = inlined_call_operand.vmem [shape: f32[1,128], index: 6, kind: input, shape index: {}]   ;;  %s466_s7 = inlined_call_operand.vmem [shape: bf16[64,128], index: 7, kind: input, shape index: {}]   ;;  %s467_s8 = inlined_call_operand.vmem [shape: f32[1,128], index: 8, kind: input, shape index: {}]   ;;  %s468_s9 = inlined_call_operand.hbm [shape: f32[8,128], index: 9, kind: output, shape index: {}]  }
   0x1   :  { %v298_v0 = vld [vmem:[%s461_s2 + $0x8] sm:$0xff]  ;;  %v306_v1 = vld [vmem:[%s463_s4 + $0x38] sm:$0xff]  ;;  %v297_v2 = vld [vmem:[%s461_s2] sm:$0xff] }
   0x2   :  { %65 = vmatpush.bf16.msra.mxu0 %v298_v0  ;;  %142 = vmatpush.bf16.msra.mxu1 %v306_v1  ;;  %v305_v3 = vld [vmem:[%s463_s4 + $0x30] sm:$0xff] }
   0x3   :  { %14 = vsyncpa [#allocation3], 0  ;;  %v34_v4 = vld [vmem:[%s459_s0] sm:$0xf]  ;;  %vm55_vm0 = vcmask 261120   ;;  %v304_v5 = vld [vmem:[%s463_s4 + $0x28] sm:$0xff] }
   0x4   :  { %v303_v6 = vld [vmem:[%s463_s4 + $0x20] sm:$0xff]  ;;  %v302_v7 = vld [vmem:[%s463_s4 + $0x18] sm:$0xff]  ;;  %v301_v8 = vld [vmem:[%s463_s4 + $0x10] sm:$0xff]  ;;  %v344_v22 = vmov 0   ;;  %vm200_vm1 = vcmask 523264   ;;  %s345_s21 = smov [#allocation2]  }
   0x5   :  { %v300_v9 = vld [vmem:[%s463_s4 + $0x8] sm:$0xff]  ;;  %v299_v10 = vld [vmem:[%s463_s4] sm:$0xff]  ;;  %v310_v11 = vld [vmem:[%s466_s7 + $0x18] sm:$0xff]  ;;  %313 = vset.pattern.permute.xlu0 %v344_v22  ;;  %s230_s24 = sshll.u32 %s468_s9, 4  ;;  %s231_s24 = int_to_ptr.hbm [resolvable:$true] %s230_s24 }
   0x6   :  { %66 = vmatpush.bf16.msra.mxu0 %v297_v2  ;;  %143 = vmatpush.bf16.msra.mxu1 %v305_v3  ;;  %v309_v12 = vld [vmem:[%s466_s7 + $0x10] sm:$0xff]  ;;  %v314_v13 = vld [vmem:[%s462_s3] ss:$0 sm:$0xff]  ;;  %v308_v19 = vld [vmem:[%s466_s7 + $0x8] sm:$0xff] }
   0x7   :  { %208 = vmatpush.bf16.msra.mxu2 %v310_v11  ;;  %v307_v20 = vld [vmem:[%s466_s7] sm:$0xff] }
   0x8   :  { %v165_v21 = vld [vmem:[%s460_s1] sm:$0xff] }
   0x9   :  { %247 = vmatmul.msk.bf16.vlgmr.msra.gmra.mxu0 %vm55_vm0, %v34_v4  ;;  %169 = vperm.xlu0 %313, %v165_v21   ;;  %v315_v23 = vld [vmem:[%s464_s5] ss:$0 sm:$0xff]  ;;  %s228_s5 = sshll.u32 %s345_s21, 4  ;;  %s229_s5 = int_to_ptr.vmem [resolvable:$true] %s228_s5 }
   0xa   :  { %144 = vmatpush.bf16.msra.mxu1 %v304_v5  ;;  %v316_v29 = vld [vmem:[%s465_s6] ss:$0 sm:$0xff] }
   0xb   :  { %209 = vmatpush.bf16.msra.mxu2 %v309_v12  ;;  %v317_v32 = vld [vmem:[%s467_s8] ss:$0 sm:$0xff] }
   0xe   :  { %145 = vmatpush.bf16.msra.mxu1 %v303_v6 }
   0xf   :  { %210 = vmatpush.bf16.msra.mxu2 %v308_v19 }
  0x12   :  { %146 = vmatpush.bf16.msra.mxu1 %v302_v7 }
  0x13   :  { %211 = vmatpush.bf16.msra.mxu2 %v307_v20 }
  0x16   :  { %147 = vmatpush.bf16.msra.mxu1 %v301_v8 }
  0x1a   :  { %148 = vmatpush.bf16.msra.mxu1 %v300_v9 }
  0x1e   :  { %149 = vmatpush.bf16.msra.mxu1 %v299_v10 }
  0x7b   :  { %v170_v30 = vpop.permute.xlu0 %169 }
  0x7c   :  { %v175_v31 = vmul.f32 %v316_v29, %v170_v30 }
  0x86   :  { %v68_v14 = vpop.f32.mrf.mxu0 }
  0x87   :  { %v69_v15 = vadd.f32 %v314_v13, %v68_v14 }
  0x89   :  { %v72_v16 = vmax.f32 %v69_v15, 0.0 }
  0x8b   :  { %v73_v17 = vpack.c.bf16 %v72_v16, %v72_v16 }
  0x8d   :  { %150 = vmatmul.bf16.vlgmr.msra.gmra.mxu1 %v73_v17 }
  0x8e   :  { %v70_v18 = vpop.f32.mrf.mxu0 }
 0x10a   :  { %v151_v24 = vpop.f32.mrf.mxu1 }
 0x10b   :  { %v152_v25 = vadd.f32 %v315_v23, %v151_v24 }
 0x10d   :  { %v155_v26 = vmax.f32 %v152_v25, 0.0 }
 0x10f   :  { %v156_v27 = vpack.c.bf16 %v155_v26, %v155_v26 }
 0x111   :  { %296 = vmatmul.msk.bf16.vlgmr.msra.gmra.mxu2 %vm200_vm1, %v156_v27 }
 0x112   :  { %v153_v28 = vpop.f32.mrf.mxu1 }
 0x194   :  { %v213_v33 = vpop.f32.mrf.mxu2 }
 0x195   :  { %v214_v34 = vadd.f32 %v213_v33, %v175_v31 }
 0x197   :  { %v221_v35 = vadd.f32 %v317_v32, %v214_v34 }
 0x199   :  { %222 = vst [vmem:[#allocation2] sm:$0xff] %v221_v35 }
 0x19a   :  { %233 = dma.vmem_to_hbm [thread:$0]  %s229_s5, 128, %s231_s24, [#allocation3]  }
 0x19c   :  { %v215_v36 = vpop.f32.mrf.mxu2 }
 0x19d   :  { %342 = dma.done.wait [#allocation3], 128  }
 0x19e   :  { %343 = vsyncadd [#allocation3], 4294967168 }
 0x19f   :  { %238 = vsyncpa [#allocation3], 1 }

</bundles_post_ra>
